<compile_context>
chip_gen: v6e
topology: v6e:2x2x1
jax: 0.10.0
libtpu: 0.0.40
codegen_flags: <defaults>
</compile_context>

<pallas_src>
import functools

import jax
import jax.numpy as jnp
import numpy as np
from jax import lax
from jax.experimental import pallas as pl
from jax.experimental.pallas import tpu as pltpu

IGNORED_INDEX = 999


def _round_up(x, m):
    return -(-x // m) * m


def _ce_loss_kernel(*refs, weights, n_tokens):
    """Per-token weighted CE over K heads.

    refs = (logits_0, ..., logits_{K-1}, targets, loss_out)
      logits_i : VMEM (tn, Vi+1) input dtype
      targets  : VMEM (tn, K)    int32
      loss_out : VMEM (tn, 1)    float32
    weights  : static tuple of K floats (baked constants).
    n_tokens : static int, true number of tokens (ragged-tail masking).
    """
    k = len(refs) - 2
    logit_refs = refs[:k]
    targets_ref = refs[k]
    loss_ref = refs[k + 1]
    tn = targets_ref.shape[0]

    tgt_all = targets_ref[...]                              # (tn, K) int32
    acc = jnp.zeros((tn, 1), jnp.float32)

    for i in range(k):
        lg = logit_refs[i][...].astype(jnp.float32)         # (tn, Vi+1)
        vi = lg.shape[1]
        tgt = tgt_all[:, i:i + 1]                           # (tn, 1)

        # Numerically stable log-sum-exp over the full head row.
        m = jnp.max(lg, axis=-1, keepdims=True)
        e = jnp.exp(lg - m)
        s = jnp.sum(e, axis=-1, keepdims=True)
        lse = m + jnp.log(s)                                # (tn, 1)

        # Target-logit gather via one-hot compare + cross-lane sum.
        col = lax.broadcasted_iota(jnp.int32, (tn, vi), 1)
        picked = jnp.sum(jnp.where(col == tgt, lg, 0.0),
                         axis=-1, keepdims=True)            # lg[tgt] (0 if OOR)

        # ignore_index gates the whole per-head term, so targets == 999 never
        # contribute regardless of the vocab size.
        not_ignored = tgt != IGNORED_INDEX
        # NOTE: out-of-range non-ignore targets contribute only the weighted
        # LSE term here; PyTorch CrossEntropyLoss would raise instead.
        acc = acc + jnp.where(not_ignored,
                              jnp.float32(weights[i]) * (lse - picked), 0.0)

    # Zero rows past the true token count (the ragged last grid block reads
    # undefined data; its writes past n_tokens are dropped by Pallas anyway).
    row = pl.program_id(0) * tn + lax.broadcasted_iota(jnp.int32, (tn, 1), 0)
    loss_ref[...] = jnp.where(row < n_tokens, acc, 0.0)


def ce_loss_forward(logits_tuple, targets_tuple, weights, vocab_sizes, reduce=True):
    """JAX wrapper mirroring CELoss.forward."""
    logits_list = logits_tuple[0]
    targets = targets_tuple[0]
    T, B, K = targets.shape
    N = T * B
    v_sizes = [int(v) + 1 for v in vocab_sizes]

    # Free views only: no packed/padded logits array is materialized in HBM.
    logits2d = [logits_list[i].reshape(N, v_sizes[i]) for i in range(K)]
    targets2d = targets.reshape(N, K).astype(jnp.int32)

    # Token-axis tile: big enough to amortize the ~0.35us per-grid-step
    # pipeline overhead; capped so the grid keeps >= 2 steps whenever possible
    # (v7x megacore sharding via dimension_semantics=("parallel",)).
    TOKENS_PER_BLOCK = 8192
    mult = 16 if any(l.dtype.itemsize < 4 for l in logits2d) else 8
    tn = max(mult, min(TOKENS_PER_BLOCK, _round_up(pl.cdiv(N, 2), mult)))
    grid = pl.cdiv(N, tn)

    kernel = functools.partial(
        _ce_loss_kernel,
        weights=tuple(float(w) for w in weights),
        n_tokens=N,
    )
    in_specs = [pl.BlockSpec((tn, v), lambda i: (i, 0)) for v in v_sizes]
    in_specs.append(pl.BlockSpec((tn, K), lambda i: (i, 0)))

    per_tok = pl.pallas_call(
        kernel,
        out_shape=jax.ShapeDtypeStruct((N, 1), jnp.float32),
        grid_spec=pltpu.PrefetchScalarGridSpec(
            num_scalar_prefetch=0,
            grid=(grid,),
            in_specs=in_specs,
            out_specs=pl.BlockSpec((tn, 1), lambda i: (i, 0)),
        ),
        compiler_params=pltpu.CompilerParams(
            dimension_semantics=("parallel",),
        ),
    )(*logits2d, targets2d)

    per_tok = per_tok[:, 0].reshape(T, B)                    # == loss.view(T, B)
    if reduce:
        # Output is only 4 B/token; the final sum()/B is left to XLA.
        return per_tok.sum() / B
    return per_tok


def ce_loss_reference(logits_tuple, targets_tuple, weights, vocab_sizes, reduce=True):
    """Pure-JAX reference for correctness checking."""
    logits_list = logits_tuple[0]
    targets = targets_tuple[0]
    T, B, K = targets.shape
    N = T * B
    loss = jnp.zeros((N,), jnp.float32)
    for i, lg in enumerate(logits_list):
        Vi = vocab_sizes[i] + 1
        lg2 = lg.reshape(N, Vi).astype(jnp.float32)
        tgt = targets[:, :, i].reshape(N).astype(jnp.int32)
        logp = jax.nn.log_softmax(lg2, axis=-1)
        safe_tgt = jnp.where(tgt == IGNORED_INDEX, 0, tgt)
        nll = -jnp.take_along_axis(logp, safe_tgt[:, None], axis=-1)[:, 0]
        nll = jnp.where(tgt == IGNORED_INDEX, 0.0, nll)
        loss = loss + weights[i] * nll
    if reduce:
        return loss.sum() / B
    return loss.reshape(T, B)


def _make_inputs(key, T, B, vocab_sizes, dtype=jnp.float32):
    K = len(vocab_sizes)
    keys = jax.random.split(key, K + 1)
    logits_list = [
        jax.random.normal(keys[i], (T, B, vocab_sizes[i] + 1),
                          dtype=jnp.float32).astype(dtype)
        for i in range(K)
    ]
    targets = jnp.stack(
        [jax.random.randint(keys[K], (T, B), 0, vocab_sizes[i] + 1)
         for i in range(K)],
        axis=-1,
    ).astype(jnp.int32)                                      # (T, B, K)
    # sprinkle in a few ignored positions
    targets = targets.at[0, 0, :].set(IGNORED_INDEX)
    targets = targets.at[min(3, T - 1), B - 1, 1].set(IGNORED_INDEX)
    return (logits_list,), (targets,)


def _check_case(key, T, B, vocab_sizes, weights, dtype, rtol, atol):
    logits_tuple, targets_tuple = _make_inputs(key, T, B, vocab_sizes, dtype)

    out = jax.block_until_ready(
        ce_loss_forward(logits_tuple, targets_tuple, weights, vocab_sizes, reduce=True))
    ref = ce_loss_reference(logits_tuple, targets_tuple, weights, vocab_sizes, reduce=True)
    np.testing.assert_allclose(np.asarray(out), np.asarray(ref), rtol=rtol, atol=atol)

    out_nr = jax.block_until_ready(
        ce_loss_forward(logits_tuple, targets_tuple, weights, vocab_sizes, reduce=False))
    ref_nr = ce_loss_reference(logits_tuple, targets_tuple, weights, vocab_sizes, reduce=False)
    np.testing.assert_allclose(np.asarray(out_nr), np.asarray(ref_nr), rtol=rtol, atol=atol)


if __name__ == "__main__":
    vocab_sizes = [13, 9, 5]        # "without eos" -> logits have Vi + 1 classes
    weights = [1.0, 0.5, 2.0]

    # small f32 shape: N=16 -> tn=8, grid=2 (exercises multi-step grid)
    _check_case(jax.random.PRNGKey(0), T=8, B=2, vocab_sizes=vocab_sizes,
                weights=weights, dtype=jnp.float32, rtol=1e-4, atol=1e-5)

    # larger f32 shape: N=1350 -> tn=680, grid=2 with a ragged last block
    _check_case(jax.random.PRNGKey(1), T=150, B=9, vocab_sizes=vocab_sizes,
                weights=weights, dtype=jnp.float32, rtol=1e-3, atol=1e-3)

    # small bf16 shape: exercises the 16-row-multiple / in-kernel-upcast path
    _check_case(jax.random.PRNGKey(2), T=8, B=2, vocab_sizes=vocab_sizes,
                weights=weights, dtype=jnp.bfloat16, rtol=1e-3, atol=1e-3)

    print("KERNEL_OK")
</pallas_src>

<mosaic_0001>
module attributes {stable_mosaic.version = 11 : i64} {
  func.func @_ce_loss_kernel(%arg0: i32, %arg1: memref<8x14xf32, #tpu.memory_space<vmem>>, %arg2: memref<8x10xf32, #tpu.memory_space<vmem>>, %arg3: memref<8x6xf32, #tpu.memory_space<vmem>>, %arg4: memref<8x3xi32, #tpu.memory_space<vmem>>, %arg5: memref<8x1xf32, #tpu.memory_space<vmem>>) attributes {dimension_semantics = [#tpu.dimension_semantics<parallel>], iteration_bounds = array<i64: 2>, scalar_prefetch = 0 : i64, scratch_operands = 0 : i64, tpu.core_type = #tpu.core_type<tc>, window_params = [{transform_indices = @transform_0, window_bounds = array<i64: 8, 14>}, {transform_indices = @transform_1, window_bounds = array<i64: 8, 10>}, {transform_indices = @transform_2, window_bounds = array<i64: 8, 6>}, {transform_indices = @transform_3, window_bounds = array<i64: 8, 3>}, {transform_indices = @transform_4, window_bounds = array<i64: 8, 1>}]} {
    %c0 = arith.constant 0 : index
    %c0_0 = arith.constant 0 : index
    %0 = vector.load %arg4[%c0, %c0_0] : memref<8x3xi32, #tpu.memory_space<vmem>>, vector<8x3xi32>
    %cst = arith.constant 0.000000e+00 : f32
    %1 = vector.broadcast %cst : f32 to vector<8x1xf32>
    %c0_1 = arith.constant 0 : index
    %c0_2 = arith.constant 0 : index
    %2 = vector.load %arg1[%c0_1, %c0_2] : memref<8x14xf32, #tpu.memory_space<vmem>>, vector<8x14xf32>
    %3 = vector.extract_strided_slice %0 {offsets = [0, 0], sizes = [8, 1], strides = [1, 1]} : vector<8x3xi32> to vector<8x1xi32>
    %cst_3 = arith.constant dense<0xFF800000> : vector<8xf32>
    %4 = vector.multi_reduction <maximumf>, %2, %cst_3 [1] : vector<8x14xf32> to vector<8xf32>
    %5 = vector.shape_cast %4 : vector<8xf32> to vector<8x1xf32>
    %6 = vector.broadcast %5 : vector<8x1xf32> to vector<8x14xf32>
    %7 = arith.subf %2, %6 : vector<8x14xf32>
    %8 = math.exp %7 : vector<8x14xf32>
    %cst_4 = arith.constant dense<0.000000e+00> : vector<8xf32>
    %9 = vector.multi_reduction <add>, %8, %cst_4 [1] : vector<8x14xf32> to vector<8xf32>
    %10 = vector.shape_cast %9 : vector<8xf32> to vector<8x1xf32>
    %11 = math.log %10 : vector<8x1xf32>
    %12 = arith.addf %5, %11 : vector<8x1xf32>
    %13 = tpu.iota {dimensions = array<i32: 1>} : vector<8x14xi32>
    %14 = vector.broadcast %3 : vector<8x1xi32> to vector<8x14xi32>
    %15 = arith.cmpi eq, %13, %14 : vector<8x14xi32>
    %cst_5 = arith.constant 0.000000e+00 : f32
    %16 = vector.broadcast %cst_5 : f32 to vector<8x14xf32>
    %17 = arith.select %15, %2, %16 : vector<8x14xi1>, vector<8x14xf32>
    %cst_6 = arith.constant dense<0.000000e+00> : vector<8xf32>
    %18 = vector.multi_reduction <add>, %17, %cst_6 [1] : vector<8x14xf32> to vector<8xf32>
    %19 = vector.shape_cast %18 : vector<8xf32> to vector<8x1xf32>
    %c999_i32 = arith.constant 999 : i32
    %20 = vector.broadcast %c999_i32 : i32 to vector<8x1xi32>
    %21 = arith.cmpi ne, %3, %20 : vector<8x1xi32>
    %22 = arith.subf %12, %19 : vector<8x1xf32>
    %cst_7 = arith.constant 1.000000e+00 : f32
    %23 = vector.broadcast %cst_7 : f32 to vector<8x1xf32>
    %24 = arith.mulf %23, %22 : vector<8x1xf32>
    %cst_8 = arith.constant 0.000000e+00 : f32
    %25 = vector.broadcast %cst_8 : f32 to vector<8x1xf32>
    %26 = arith.select %21, %24, %25 : vector<8x1xi1>, vector<8x1xf32>
    %27 = arith.addf %1, %26 : vector<8x1xf32>
    %c0_9 = arith.constant 0 : index
    %c0_10 = arith.constant 0 : index
    %28 = vector.load %arg2[%c0_9, %c0_10] : memref<8x10xf32, #tpu.memory_space<vmem>>, vector<8x10xf32>
    %29 = vector.extract_strided_slice %0 {offsets = [0, 1], sizes = [8, 1], strides = [1, 1]} : vector<8x3xi32> to vector<8x1xi32>
    %cst_11 = arith.constant dense<0xFF800000> : vector<8xf32>
    %30 = vector.multi_reduction <maximumf>, %28, %cst_11 [1] : vector<8x10xf32> to vector<8xf32>
    %31 = vector.shape_cast %30 : vector<8xf32> to vector<8x1xf32>
    %32 = vector.broadcast %31 : vector<8x1xf32> to vector<8x10xf32>
    %33 = arith.subf %28, %32 : vector<8x10xf32>
    %34 = math.exp %33 : vector<8x10xf32>
    %cst_12 = arith.constant dense<0.000000e+00> : vector<8xf32>
    %35 = vector.multi_reduction <add>, %34, %cst_12 [1] : vector<8x10xf32> to vector<8xf32>
    %36 = vector.shape_cast %35 : vector<8xf32> to vector<8x1xf32>
    %37 = math.log %36 : vector<8x1xf32>
    %38 = arith.addf %31, %37 : vector<8x1xf32>
    %39 = tpu.iota {dimensions = array<i32: 1>} : vector<8x10xi32>
    %40 = vector.broadcast %29 : vector<8x1xi32> to vector<8x10xi32>
    %41 = arith.cmpi eq, %39, %40 : vector<8x10xi32>
    %cst_13 = arith.constant 0.000000e+00 : f32
    %42 = vector.broadcast %cst_13 : f32 to vector<8x10xf32>
    %43 = arith.select %41, %28, %42 : vector<8x10xi1>, vector<8x10xf32>
    %cst_14 = arith.constant dense<0.000000e+00> : vector<8xf32>
    %44 = vector.multi_reduction <add>, %43, %cst_14 [1] : vector<8x10xf32> to vector<8xf32>
    %45 = vector.shape_cast %44 : vector<8xf32> to vector<8x1xf32>
    %c999_i32_15 = arith.constant 999 : i32
    %46 = vector.broadcast %c999_i32_15 : i32 to vector<8x1xi32>
    %47 = arith.cmpi ne, %29, %46 : vector<8x1xi32>
    %48 = arith.subf %38, %45 : vector<8x1xf32>
    %cst_16 = arith.constant 5.000000e-01 : f32
    %49 = vector.broadcast %cst_16 : f32 to vector<8x1xf32>
    %50 = arith.mulf %49, %48 : vector<8x1xf32>
    %cst_17 = arith.constant 0.000000e+00 : f32
    %51 = vector.broadcast %cst_17 : f32 to vector<8x1xf32>
    %52 = arith.select %47, %50, %51 : vector<8x1xi1>, vector<8x1xf32>
    %53 = arith.addf %27, %52 : vector<8x1xf32>
    %c0_18 = arith.constant 0 : index
    %c0_19 = arith.constant 0 : index
    %54 = vector.load %arg3[%c0_18, %c0_19] : memref<8x6xf32, #tpu.memory_space<vmem>>, vector<8x6xf32>
    %55 = vector.extract_strided_slice %0 {offsets = [0, 2], sizes = [8, 1], strides = [1, 1]} : vector<8x3xi32> to vector<8x1xi32>
    %cst_20 = arith.constant dense<0xFF800000> : vector<8xf32>
    %56 = vector.multi_reduction <maximumf>, %54, %cst_20 [1] : vector<8x6xf32> to vector<8xf32>
    %57 = vector.shape_cast %56 : vector<8xf32> to vector<8x1xf32>
    %58 = vector.broadcast %57 : vector<8x1xf32> to vector<8x6xf32>
    %59 = arith.subf %54, %58 : vector<8x6xf32>
    %60 = math.exp %59 : vector<8x6xf32>
    %cst_21 = arith.constant dense<0.000000e+00> : vector<8xf32>
    %61 = vector.multi_reduction <add>, %60, %cst_21 [1] : vector<8x6xf32> to vector<8xf32>
    %62 = vector.shape_cast %61 : vector<8xf32> to vector<8x1xf32>
    %63 = math.log %62 : vector<8x1xf32>
    %64 = arith.addf %57, %63 : vector<8x1xf32>
    %65 = tpu.iota {dimensions = array<i32: 1>} : vector<8x6xi32>
    %66 = vector.broadcast %55 : vector<8x1xi32> to vector<8x6xi32>
    %67 = arith.cmpi eq, %65, %66 : vector<8x6xi32>
    %cst_22 = arith.constant 0.000000e+00 : f32
    %68 = vector.broadcast %cst_22 : f32 to vector<8x6xf32>
    %69 = arith.select %67, %54, %68 : vector<8x6xi1>, vector<8x6xf32>
    %cst_23 = arith.constant dense<0.000000e+00> : vector<8xf32>
    %70 = vector.multi_reduction <add>, %69, %cst_23 [1] : vector<8x6xf32> to vector<8xf32>
    %71 = vector.shape_cast %70 : vector<8xf32> to vector<8x1xf32>
    %c999_i32_24 = arith.constant 999 : i32
    %72 = vector.broadcast %c999_i32_24 : i32 to vector<8x1xi32>
    %73 = arith.cmpi ne, %55, %72 : vector<8x1xi32>
    %74 = arith.subf %64, %71 : vector<8x1xf32>
    %cst_25 = arith.constant 2.000000e+00 : f32
    %75 = vector.broadcast %cst_25 : f32 to vector<8x1xf32>
    %76 = arith.mulf %75, %74 : vector<8x1xf32>
    %cst_26 = arith.constant 0.000000e+00 : f32
    %77 = vector.broadcast %cst_26 : f32 to vector<8x1xf32>
    %78 = arith.select %73, %76, %77 : vector<8x1xi1>, vector<8x1xf32>
    %79 = arith.addf %53, %78 : vector<8x1xf32>
    %c8_i32 = arith.constant 8 : i32
    %80 = arith.muli %arg0, %c8_i32 : i32
    %81 = tpu.iota {dimensions = array<i32: 0>} : vector<8x1xi32>
    %82 = vector.broadcast %80 : i32 to vector<8x1xi32>
    %83 = arith.addi %82, %81 : vector<8x1xi32>
    %c16_i32 = arith.constant 16 : i32
    %84 = vector.broadcast %c16_i32 : i32 to vector<8x1xi32>
    %85 = arith.cmpi slt, %83, %84 : vector<8x1xi32>
    %cst_27 = arith.constant 0.000000e+00 : f32
    %86 = vector.broadcast %cst_27 : f32 to vector<8x1xf32>
    %87 = arith.select %85, %79, %86 : vector<8x1xi1>, vector<8x1xf32>
    %c0_28 = arith.constant 0 : index
    %c0_29 = arith.constant 0 : index
    %88 = vector.load %arg5[%c0_28, %c0_29] : memref<8x1xf32, #tpu.memory_space<vmem>>, vector<8x1xf32>
    tpu.vector_store %arg5[%c0_28, %c0_29], %87 {strides = array<i32>} : memref<8x1xf32, #tpu.memory_space<vmem>>, vector<8x1xf32>,
    return
  }
  func.func @transform_0(%arg0: i32) -> (i32, i32) {
    %c0_i32 = arith.constant 0 : i32
    %c0_i32_0 = arith.constant 0 : i32
    return %arg0, %c0_i32 : i32, i32
  }
  func.func @transform_1(%arg0: i32) -> (i32, i32) {
    %c0_i32 = arith.constant 0 : i32
    %c0_i32_0 = arith.constant 0 : i32
    return %arg0, %c0_i32 : i32, i32
  }
  func.func @transform_2(%arg0: i32) -> (i32, i32) {
    %c0_i32 = arith.constant 0 : i32
    %c0_i32_0 = arith.constant 0 : i32
    return %arg0, %c0_i32 : i32, i32
  }
  func.func @transform_3(%arg0: i32) -> (i32, i32) {
    %c0_i32 = arith.constant 0 : i32
    %c0_i32_0 = arith.constant 0 : i32
    return %arg0, %c0_i32 : i32, i32
  }
  func.func @transform_4(%arg0: i32) -> (i32, i32) {
    %c0_i32 = arith.constant 0 : i32
    %c0_i32_0 = arith.constant 0 : i32
    return %arg0, %c0_i32 : i32, i32
  }
}

</mosaic_0001>

<bundles_post_ra>
// kernel: tpu_custom_call.1
= control target key start
LH: loop header
LB: loop body
LE: loop exit
PB: predicated region body
PF: predicated region fallthrough
CT: control target
= control target key end

     0   :  { %s511_s15 = smov 0   ;;  %s570_s0 = inlined_call_operand.vmem [shape: f32[16,14], index: 0, kind: input, shape index: {}]   ;;  %s571_s1 = inlined_call_operand.vmem [shape: f32[16,10], index: 1, kind: input, shape index: {}]   ;;  %s572_s2 = inlined_call_operand.vmem [shape: f32[16,6], index: 2, kind: input, shape index: {}]   ;;  %s573_s3 = inlined_call_operand.vmem [shape: s32[16,3], index: 3, kind: input, shape index: {}]   ;;  %s574_s4 = inlined_call_operand.vmem [shape: f32[16,1], index: 4, kind: output, shape index: {}]  }
   0x1 LB: > { %s517_s16 = sadd.s32 4294967295, %s479_s15   ;;  %p435_p0 = scmp.ge.s32.totalorder %s479_s15, 1  ;;  %s479_s15 = sphi %s511_s15, %s14_s15  }
   0x2   : > { %p188_p1 = scmp.lt.s32.totalorder %s479_s15, 3 }
   0x4   : > { %p189_p2 = pnand %p435_p0, %p188_p1 }
   0x5   : > { %p224_p3 = scmp.lt.s32.totalorder (!%p189_p2), %s517_s16, 1  ;;  %s484_s5 = smov (!%p189_p2), 127  }
   0x6   : > { %192 = sbr.rel (%p189_p2) target bundleno = 496 (0x1f0), region = 36  ;;  %s485_s6 = smov (!%p189_p2), 126  }
   0x7   : > { %s441_s7 = sshll.u32 (!%p189_p2), %s517_s16, 3 }
   0xb   : > { %v481_v0 = vmov 1   ;;  %s225_s17 = scalar_select %p224_p3, %s517_s16, 1  ;;  %vm274_vm0 = vcmask 80896   ;;  %vm304_vm1 = vcmask 48128   ;;  %v482_v6 = vmov 2  }
   0xc   : > { %457 = vset.pattern.permute.xlu1 %v481_v0  ;;  %vm246_vm2 = vcmask 113664   ;;  %v483_v9 = vmov 0   ;;  %v259_v16 = vlaneseq  ;;  %v336_v57 = vstv %s441_s7 }
   0xd   : > { %s523_s18 = sshll.u32 %s225_s17, 3  ;;  %459 = vset.pattern.permute.xlu0 %v483_v9  ;;  %vm340_vm8 = vcmask 7168  }
   0xe   : > { %s231_s21 = scalar_lea.vmem %s571_s1, %s523_s18  ;;  %s235_s24 = scalar_lea.vmem %s572_s2, %s523_s18  ;;  %v260_v18 = vand.u32 127, %v259_v16  ;;  %v335_v56 = vshrl.u32 %v259_v16, 7 }
   0xf   : > { %v273_v1 = vld [vmem:[%s231_s21] sm:$0xff]  ;;  %s239_s27 = scalar_lea.vmem %s573_s3, %s523_s18  ;;  %s227_s30 = scalar_lea.vmem %s570_s0, %s523_s18 }
  0x10   : > { %v303_v2 = vld [vmem:[%s235_s24] sm:$0xff]  ;;  %v275_v3 = vsel %vm274_vm0, %v273_v1, -inf  ;;  %v337_v60 = vadd.s32 %v336_v57, %v335_v56  ;;  %s243_s10 = scalar_lea.vmem %s574_s4, %s523_s18 }
  0x11   : > { %v538_v4 = vld [vmem:[%s239_s27] sm:$0xff]  ;;  %276 = vmax.xlane.f32.xlu0 %v275_v3  ;;  %v305_v5 = vsel %vm304_vm1, %v303_v2, -inf }
  0x12   : > { %288 = vperm.xlu1 %457, %v538_v4   ;;  %v245_v7 = vld [vmem:[%s227_s30] sm:$0xff]  ;;  %vm269_vm6 = vcmp.ne.s32.totalorder %v538_v4, 999  ;;  %vm338_vm7 = vcmp.lt.s32.totalorder %v337_v60, 16 }
  0x13   : > { %v247_v8 = vsel %vm246_vm2, %v245_v7, -inf }
  0x15   : > { %306 = vmax.xlane.f32.xlu0 %v305_v5 }
  0x16   : > { %458 = vset.pattern.permute.xlu1 %v482_v6 }
  0x17   : > { %318 = vperm.xlu1 %458, %v538_v4  }
  0x19   : > { %248 = vmax.xlane.f32.xlu0 %v247_v8 }
  0x8d   : > { %v289_v17 = vpop.permute.xlu1 %288 }
  0x8e   : > { %vm290_vm3 = vcmp.eq.s32.totalorder %v260_v18, %v289_v17 }
  0x8f   : > { %v291_v21 = vsel %vm290_vm3, %v273_v1, 0.0 }
  0x90   : > { %v292_v23 = vsel %vm274_vm0, %v291_v21, 0.0 }
  0x92   : > { %v319_v19 = vpop.permute.xlu1 %318 }
  0x93   : > { %vm320_vm4 = vcmp.eq.s32.totalorder %v260_v18, %v319_v19 }
  0x94   : > { %v321_v25 = vsel %vm320_vm4, %v303_v2, 0.0 }
  0x95   : > { %v322_v27 = vsel %vm304_vm1, %v321_v25, 0.0 }
  0x9a   : > { %v277_v10 = vpop.xlane.xlu0 %276 }
  0x9b   : > { %v278_v11 = vsub.f32 %v273_v1, %v277_v10 }
  0x9d   : > { %v279_v12 = vmul.f32 1.442695, %v278_v11 }
  0x9e   : > { %v307_v13 = vpop.xlane.xlu0 %306 }
  0x9f   : > { %461 = vpow2.f32 %v279_v12  ;;  %v308_v14 = vsub.f32 %v303_v2, %v307_v13 }
  0xa1   : > { %v309_v15 = vmul.f32 1.442695, %v308_v14 }
  0xa2   : > { %v249_v28 = vpop.xlane.xlu0 %248 }
  0xa3   : > { %463 = vpow2.f32 %v309_v15  ;;  %v250_v29 = vsub.f32 %v245_v7, %v249_v28 }
  0xa5   : > { %v251_v30 = vmul.f32 1.442695, %v250_v29 }
  0xa7   : > { %465 = vpow2.f32 %v251_v30 }
  0xac   : > { %v462_v20 = vpop.eup %461 }
  0xad   : > { %v281_v22 = vsel %vm274_vm0, %v462_v20, 0.0 }
  0xae   : > { %282 = vadd.xlane.f32.xlu1 %v281_v22 }
  0xb0   : > { %v464_v24 = vpop.eup %463 }
  0xb1   : > { %v311_v26 = vsel %vm304_vm1, %v464_v24, 0.0 }
  0xb2   : > { %312 = vadd.xlane.f32.xlu0 %v311_v26  ;;  %293 = vadd.xlane.f32.xlu1 %v292_v23 }
  0xb4   : > { %v466_v34 = vpop.eup %465 }
  0xb5   : > { %v253_v41 = vsel %vm246_vm2, %v466_v34, 0.0 }
  0xb6   : > { %323 = vadd.xlane.f32.xlu1 %v322_v27 }
  0xc8   : > { %262 = vperm.xlu0 %459, %v538_v4  }
  0xcc   : > { %460 = vset.pattern.permute.xlu0 %v482_v6 }
 0x137   : > { %v283_v31 = vpop.xlane.xlu1 %282 }
 0x138   : > { %467 = vlog2.f32 %v283_v31 }
 0x13b   : > { %v313_v32 = vpop.xlane.xlu0 %312  ;;  %v294_v39 = vpop.xlane.xlu1 %293 }
 0x13c   : > { %469 = vlog2.f32 %v313_v32 }
 0x13f   : > { %v324_v48 = vpop.xlane.xlu1 %323 }
 0x143   : > { %v263_v33 = vpop.permute.xlu0 %262 }
 0x144   : > { %vm264_vm5 = vcmp.eq.s32.totalorder %v260_v18, %v263_v33 }
 0x145   : > { %v468_v35 = vpop.eup %467  ;;  %v265_v36 = vsel %vm264_vm5, %v245_v7, 0.0 }
 0x146   : > { %v285_v37 = vmul.f32 0.6931472, %v468_v35  ;;  %v266_v38 = vsel %vm246_vm2, %v265_v36, 0.0 }
 0x147   : > { %267 = vadd.xlane.f32.xlu1 %v266_v38 }
 0x148   : > { %v286_v40 = vadd.f32 %v285_v37, %v277_v10 }
 0x149   : > { %v470_v42 = vpop.eup %469 }
 0x14a   : > { %v295_v43 = vsub.f32 %v286_v40, %v294_v39  ;;  %v315_v44 = vmul.f32 0.6931472, %v470_v42 }
 0x14b   : > { %254 = vadd.xlane.f32.xlu1 %v253_v41 }
 0x14c   : > { %v296_v45 = vmul.f32 0.5, %v295_v43  ;;  %v316_v47 = vadd.f32 %v315_v44, %v307_v13 }
 0x14e   : > { %v297_v46 = vsel %vm269_vm6, %v296_v45, 0.0  ;;  %v325_v49 = vsub.f32 %v316_v47, %v324_v48 }
 0x14f   : > { %299 = vrot.lane.b32.xlu0 %v297_v46, %s484_s5 }
 0x150   : > { %v326_v50 = vmul.f32 2.0, %v325_v49 }
 0x152   : > { %v327_v51 = vsel %vm269_vm6, %v326_v50, 0.0 }
 0x15c   : > { %329 = vrot.lane.b32.xlu1 %v327_v51, %s485_s6 }
 0x1c1   : > { %v300_v61 = vpop.permute.xlu0 %299 }
 0x1d0   : > { %v268_v52 = vpop.xlane.xlu1 %267 }
 0x1d4   : > { %v255_v53 = vpop.xlane.xlu1 %254 }
 0x1d5   : > { %471 = vlog2.f32 %v255_v53 }
 0x1d8   : > { %v330_v0 = vpop.permute.xlu1 %329 }
 0x1e2   : > { %v472_v54 = vpop.eup %471 }
 0x1e3   : > { %v257_v55 = vmul.f32 0.6931472, %v472_v54 }
 0x1e5   : > { %v258_v58 = vadd.f32 %v257_v55, %v249_v28 }
 0x1e7   : > { %v270_v59 = vsub.f32 %v258_v58, %v268_v52 }
 0x1e9   : > { %v271_v62 = vsel %vm269_vm6, %v270_v59, 0.0 }
 0x1ea   : > { %v302_v63 = vadd.f32 %v300_v61, %v271_v62 }
 0x1ec   : > { %v332_v1 = vadd.f32 %v330_v0, %v302_v63 }
 0x1ee   : > { %v339_v2 = vsel %vm338_vm7, %v332_v1, 0.0 }
 0x1ef   : > { %341 = vst.msk [vmem:[%s243_s10] sm:$0xff] %vm340_vm8, %v339_v2 }
 0x1f0 PF: > { %s14_s15 = sadd.s32 1, %s479_s15  }
 0x1f1   : > { %p11_p4 = scmp.ge.s32.totalorder %s14_s15, 4  }
 0x1f3   :  { %13 = sbr.rel (!%p11_p4) target bundleno = 1 (0x1), region = 75 }

</bundles_post_ra>
